<compile_context>
chip_gen: v6e
topology: v6e:2x2x1
jax: 0.10.0
libtpu: 0.0.40
codegen_flags: <defaults>
</compile_context>

<pallas_src>
import numpy as np
import jax
import jax.numpy as jnp
from jax import lax
from jax.experimental import pallas as pl
from jax.experimental.pallas import tpu as pltpu

LANE = 128                               # vreg lane width
STRIP_ROWS = 512                         # inner strip rows (keeps chain vreg-resident)
TARGET_BLOCK_BYTES = 4 * 1024 * 1024     # combined (outputs+targets) bytes per grid step
VMEM_LIMIT_BYTES = 32 * 1024 * 1024      # explicit scoped-VMEM limit (safe on v5e..v7x)


def _round_up(x, m):
    return ((x + m - 1) // m) * m


def _make_kernel(threshold, total, block_rows, strip_rows, blocks_per_core):
    """All closed-over values are Python scalars (no captured jax arrays)."""
    thr = float(threshold)
    block_elems = block_rows * LANE
    strip_elems = strip_rows * LANE
    n_strips = block_rows // strip_rows

    def _strip_eq(out_ref, tgt_ref, g):
        r0 = pl.multiple_of(g * strip_rows, strip_rows)
        o = out_ref[pl.ds(r0, strip_rows), :].astype(jnp.float32)
        t = tgt_ref[pl.ds(r0, strip_rows), :].astype(jnp.int32)   # targets.int()
        preds = (o >= thr).astype(jnp.int32)                      # torch.ge(outputs, t).int()
        return preds == t                                         # bool (strip_rows, LANE)

    def _fold(x_i32):
        # (strip_rows, 128) -> (8, 128) with VPU adds only (no cross-lane work).
        return jnp.sum(x_i32.reshape(strip_rows // 8, 8, LANE), axis=0)

    def kernel(out_ref, tgt_ref, acc_ref):
        c = pl.program_id(0)   # core-split axis (size 1 on v5e/v6e)
        i = pl.program_id(1)   # reduction axis

        @pl.when(i == 0)
        def _():
            acc_ref[...] = jnp.zeros_like(acc_ref)

        # Logical (unclamped) block index -> global element base.
        base = (c * blocks_per_core + i) * block_elems
        is_full = (base + block_elems) <= total

        # Fast path: interior block, no masking work at all.
        @pl.when(is_full)
        def _():
            def body(g, part):
                eq = _strip_eq(out_ref, tgt_ref, g)
                return part + _fold(eq.astype(jnp.int32))
            acc_ref[...] += lax.fori_loop(
                0, n_strips, body, jnp.zeros((8, LANE), jnp.int32), unroll=True)

        # Tail / duplicated-clamped block: mask against the true element count.
        @pl.when(jnp.logical_not(is_full))
        def _():
            row_ids = lax.broadcasted_iota(jnp.int32, (strip_rows, LANE), 0)
            col_ids = lax.broadcasted_iota(jnp.int32, (strip_rows, LANE), 1)
            strip_idx = row_ids * LANE + col_ids   # hoisted out of the strip loop

            def body(g, part):
                eq = _strip_eq(out_ref, tgt_ref, g)
                valid = (base + g * strip_elems + strip_idx) < total
                ok = jnp.logical_and(eq, valid).astype(jnp.int32)
                return part + _fold(ok)
            acc_ref[...] += lax.fori_loop(
                0, n_strips, body, jnp.zeros((8, LANE), jnp.int32), unroll=True)

    return kernel


def _pallas_correct_count(out2d, tgt2d, threshold, total, block_rows, strip_rows,
                          num_splits, core_parallel):
    rows = out2d.shape[0]
    total_blocks = -(-rows // block_rows)
    blocks_per_core = -(-total_blocks // num_splits)

    kernel = _make_kernel(threshold, total, block_rows, strip_rows, blocks_per_core)

    def in_index_map(c, i):
        if num_splits == 1:
            return (i, 0)
        # Clamp so the DMA never walks past the last real block; the kernel's
        # logical-index mask zeroes out any duplicated/overhanging block.
        return (jnp.minimum(c * blocks_per_core + i, total_blocks - 1), 0)

    if core_parallel:
        semantics = (pltpu.CORE_PARALLEL, pltpu.ARBITRARY)
    else:
        semantics = ("parallel", "arbitrary")

    bytes_accessed = (total * (out2d.dtype.itemsize + tgt2d.dtype.itemsize)
                      + num_splits * 8 * LANE * 4)
    cost = pl.CostEstimate(flops=2 * total, transcendentals=0,
                           bytes_accessed=bytes_accessed)

    acc = pl.pallas_call(
        kernel,
        out_shape=jax.ShapeDtypeStruct((num_splits * 8, LANE), jnp.int32),
        grid_spec=pltpu.PrefetchScalarGridSpec(
            num_scalar_prefetch=0,
            grid=(num_splits, blocks_per_core),
            in_specs=[
                pl.BlockSpec((block_rows, LANE), in_index_map),
                pl.BlockSpec((block_rows, LANE), in_index_map),
            ],
            out_specs=pl.BlockSpec((8, LANE), lambda c, i: (c, 0)),
        ),
        compiler_params=pltpu.CompilerParams(
            dimension_semantics=semantics,
            vmem_limit_bytes=VMEM_LIMIT_BYTES),
        cost_estimate=cost,
    )(out2d, tgt2d)

    # Single cross-lane reduce, done once, outside the kernel.
    return jnp.sum(acc)


def accuracy_segmentation(outputs, targets, threshold):
    """Pallas implementation of AccuracySegmentation.forward."""
    if outputs.shape[0] != targets.shape[0]:
        raise ValueError(
            "Error in Accuracy Seg.: output batch dim must equal target batch dim")

    n = 1
    for ns in targets.shape:
        n *= ns

    thr = float(threshold)
    out_flat = jnp.ravel(outputs)
    tgt_flat = jnp.ravel(targets)
    total = out_flat.size

    # Tiny-input bypass: fixed pallas_call cost dominates below one vreg tile.
    if total < LANE * 8:
        preds = (out_flat.astype(jnp.float32) >= thr).astype(jnp.int32)
        t = tgt_flat.astype(jnp.int32)
        return jnp.sum((preds == t).astype(jnp.float32)) / jnp.float32(n)

    # Small pad (< 1024 elements) so the flat stream reshapes for free to a
    # lane-dense (rows, 128) slab with rows a multiple of 8.
    padded = _round_up(total, LANE * 8)
    if padded != total:
        out_flat = jnp.pad(out_flat, (0, padded - total))
        tgt_flat = jnp.pad(tgt_flat, (0, padded - total))
    rows = padded // LANE
    out2d = out_flat.reshape(rows, LANE)
    tgt2d = tgt_flat.reshape(rows, LANE)

    # Dtype-aware block sizing by bytes (~2 MiB per f32 input block).
    bytes_per_row = LANE * (out2d.dtype.itemsize + tgt2d.dtype.itemsize)
    max_block_rows = max(STRIP_ROWS,
                         (TARGET_BLOCK_BYTES // bytes_per_row) // STRIP_ROWS * STRIP_ROWS)
    if rows >= STRIP_ROWS:
        block_rows = min(max_block_rows, (rows // STRIP_ROWS) * STRIP_ROWS)
        strip_rows = STRIP_ROWS
    else:
        block_rows = rows
        strip_rows = rows

    # 2-way core split only where it can actually land on two TensorCores
    # (v7x).  Single pass on v5e/v6e -> no duplicated clamped-block DMA.
    try:
        kind = jax.devices()[0].device_kind.lower()
    except Exception:
        kind = ""
    want_two_cores = ("v7" in kind) or ("7x" in kind)

    if want_two_cores:
        try:
            correct = _pallas_correct_count(out2d, tgt2d, thr, total, block_rows,
                                            strip_rows, 2, True)
            return correct.astype(jnp.float32) / jnp.float32(n)
        except Exception:
            pass  # fall back to the portable path below

    correct = _pallas_correct_count(out2d, tgt2d, thr, total, block_rows,
                                    strip_rows, 1, False)
    return correct.astype(jnp.float32) / jnp.float32(n)


def _numpy_reference(outputs, targets, threshold):
    o = np.asarray(outputs)
    t = np.asarray(targets)
    preds = (o >= threshold).astype(np.int32)
    tgt = t.astype(np.int32)
    return (preds == tgt).astype(np.float32).sum() / t.size


if __name__ == "__main__":
    key = jax.random.PRNGKey(0)
    k1, k2, k3, k4 = jax.random.split(key, 4)
    threshold = 0.5

    # Test 1: segmentation-head-sized input (B, C, H, W) — single full block.
    B, C, H, W = 2, 4, 16, 16
    outputs1 = jax.random.uniform(k1, (B, C, H, W), dtype=jnp.float32)
    targets1 = (jax.random.uniform(k2, (B, C, H, W)) > 0.5).astype(jnp.float32)
    acc1 = jax.block_until_ready(accuracy_segmentation(outputs1, targets1, threshold))
    ref1 = _numpy_reference(outputs1, targets1, threshold)
    assert abs(float(acc1) - float(ref1)) < 1e-6, (float(acc1), float(ref1))

    # Test 2: ragged size (not a multiple of 128) — exercises the masked tail path.
    outputs2 = jax.random.uniform(k3, (3, 3, 37, 29), dtype=jnp.float32)
    targets2 = (jax.random.uniform(k4, (3, 3, 37, 29)) > 0.5).astype(jnp.float32)
    acc2 = jax.block_until_ready(accuracy_segmentation(outputs2, targets2, threshold))
    ref2 = _numpy_reference(outputs2, targets2, threshold)
    assert abs(float(acc2) - float(ref2)) < 1e-6, (float(acc2), float(ref2))

    # Test 3: multi-block / multi-strip streaming path.
    outputs3 = jax.random.uniform(k1, (4, 8, 64, 40), dtype=jnp.float32)
    targets3 = (jax.random.uniform(k2, (4, 8, 64, 40)) > 0.5).astype(jnp.float32)
    acc3 = jax.block_until_ready(accuracy_segmentation(outputs3, targets3, threshold))
    ref3 = _numpy_reference(outputs3, targets3, threshold)
    assert abs(float(acc3) - float(ref3)) < 1e-6, (float(acc3), float(ref3))

    print("KERNEL_OK")
</pallas_src>

<mosaic_0001>
module attributes {stable_mosaic.version = 11 : i64} {
  func.func @kernel(%arg0: i32, %arg1: i32, %arg2: memref<16x128xf32, #tpu.memory_space<vmem>>, %arg3: memref<16x128xf32, #tpu.memory_space<vmem>>, %arg4: memref<8x128xi32, #tpu.memory_space<vmem>>) attributes {dimension_semantics = [#tpu.dimension_semantics<parallel>, #tpu.dimension_semantics<arbitrary>], iteration_bounds = array<i64: 1, 1>, scalar_prefetch = 0 : i64, scratch_operands = 0 : i64, tpu.core_type = #tpu.core_type<tc>, window_params = [{transform_indices = @transform_0, window_bounds = array<i64: 16, 128>}, {transform_indices = @transform_1, window_bounds = array<i64: 16, 128>}, {transform_indices = @transform_2, window_bounds = array<i64: 8, 128>}]} {
    %c0_i32 = arith.constant 0 : i32
    %0 = arith.cmpi eq, %arg1, %c0_i32 : i32
    %1 = arith.extui %0 : i1 to i32
    %c0_i32_0 = arith.constant 0 : i32
    %2 = arith.cmpi ne, %1, %c0_i32_0 : i32
    scf.if %2 {
      %c0_i32_5 = arith.constant 0 : i32
      %13 = vector.broadcast %c0_i32_5 : i32 to vector<8x128xi32>
      %c0 = arith.constant 0 : index
      %c0_6 = arith.constant 0 : index
      %14 = vector.load %arg4[%c0, %c0_6] : memref<8x128xi32, #tpu.memory_space<vmem>>, vector<8x128xi32>
      tpu.vector_store %arg4[%c0, %c0_6], %13 {strides = array<i32>} : memref<8x128xi32, #tpu.memory_space<vmem>>, vector<8x128xi32>,
    } else {
    }
    %c1_i32 = arith.constant 1 : i32
    %3 = arith.muli %arg0, %c1_i32 : i32
    %4 = arith.addi %3, %arg1 : i32
    %c2048_i32 = arith.constant 2048 : i32
    %5 = arith.muli %4, %c2048_i32 : i32
    %c2048_i32_1 = arith.constant 2048 : i32
    %6 = arith.addi %5, %c2048_i32_1 : i32
    %c2048_i32_2 = arith.constant 2048 : i32
    %7 = arith.cmpi sle, %6, %c2048_i32_2 : i32
    %8 = arith.extui %7 : i1 to i32
    %c0_i32_3 = arith.constant 0 : i32
    %9 = arith.cmpi ne, %8, %c0_i32_3 : i32
    scf.if %9 {
      %c0 = arith.constant 0 : index
      %c0_5 = arith.constant 0 : index
      %13 = vector.load %arg4[%c0, %c0_5] : memref<8x128xi32, #tpu.memory_space<vmem>>, vector<8x128xi32>
      %c0_i32_6 = arith.constant 0 : i32
      %14 = vector.broadcast %c0_i32_6 : i32 to vector<8x128xi32>
      %c0_i32_7 = arith.constant 0 : i32
      %c16_i32 = arith.constant 16 : i32
      %15 = arith.muli %c0_i32_7, %c16_i32 : i32
      %16 = tpu.assume_multiple %15, 16 : i32
      %17 = arith.index_cast %16 : i32 to index
      %c0_8 = arith.constant 0 : index
      %18 = vector.load %arg2[%17, %c0_8] : memref<16x128xf32, #tpu.memory_space<vmem>>, vector<16x128xf32>
      %19 = arith.index_cast %16 : i32 to index
      %c0_9 = arith.constant 0 : index
      %20 = vector.load %arg3[%19, %c0_9] : memref<16x128xf32, #tpu.memory_space<vmem>>, vector<16x128xf32>
      %21 = arith.fptosi %20 : vector<16x128xf32> to vector<16x128xi32>
      %cst = arith.constant 5.000000e-01 : f32
      %22 = vector.broadcast %cst : f32 to vector<16x128xf32>
      %23 = arith.cmpf oge, %18, %22 : vector<16x128xf32>
      %24 = arith.extui %23 : vector<16x128xi1> to vector<16x128xi32>
      %25 = arith.cmpi eq, %24, %21 : vector<16x128xi32>
      %26 = arith.extui %25 : vector<16x128xi1> to vector<16x128xi32>
      %27 = vector.shape_cast %26 : vector<16x128xi32> to vector<2x8x128xi32>
      %cst_10 = arith.constant dense<0> : vector<8x128xi32>
      %28 = vector.multi_reduction <add>, %27, %cst_10 [0] : vector<2x8x128xi32> to vector<8x128xi32>
      %29 = arith.addi %14, %28 : vector<8x128xi32>
      %c1_i32_11 = arith.constant 1 : i32
      %30 = arith.addi %13, %29 : vector<8x128xi32>
      %c0_12 = arith.constant 0 : index
      %c0_13 = arith.constant 0 : index
      %31 = vector.load %arg4[%c0_12, %c0_13] : memref<8x128xi32, #tpu.memory_space<vmem>>, vector<8x128xi32>
      tpu.vector_store %arg4[%c0_12, %c0_13], %30 {strides = array<i32>} : memref<8x128xi32, #tpu.memory_space<vmem>>, vector<8x128xi32>,
    } else {
    }
    %true = arith.constant true
    %10 = arith.xori %7, %true : i1
    %11 = arith.extui %10 : i1 to i32
    %c0_i32_4 = arith.constant 0 : i32
    %12 = arith.cmpi ne, %11, %c0_i32_4 : i32
    scf.if %12 {
      %13 = tpu.iota {dimensions = array<i32: 0>} : vector<16x128xi32>
      %14 = tpu.iota {dimensions = array<i32: 1>} : vector<16x128xi32>
      %c128_i32 = arith.constant 128 : i32
      %15 = vector.broadcast %c128_i32 : i32 to vector<16x128xi32>
      %16 = arith.muli %13, %15 : vector<16x128xi32>
      %17 = arith.addi %16, %14 : vector<16x128xi32>
      %c0 = arith.constant 0 : index
      %c0_5 = arith.constant 0 : index
      %18 = vector.load %arg4[%c0, %c0_5] : memref<8x128xi32, #tpu.memory_space<vmem>>, vector<8x128xi32>
      %c0_i32_6 = arith.constant 0 : i32
      %19 = vector.broadcast %c0_i32_6 : i32 to vector<8x128xi32>
      %c0_i32_7 = arith.constant 0 : i32
      %c16_i32 = arith.constant 16 : i32
      %20 = arith.muli %c0_i32_7, %c16_i32 : i32
      %21 = tpu.assume_multiple %20, 16 : i32
      %22 = arith.index_cast %21 : i32 to index
      %c0_8 = arith.constant 0 : index
      %23 = vector.load %arg2[%22, %c0_8] : memref<16x128xf32, #tpu.memory_space<vmem>>, vector<16x128xf32>
      %24 = arith.index_cast %21 : i32 to index
      %c0_9 = arith.constant 0 : index
      %25 = vector.load %arg3[%24, %c0_9] : memref<16x128xf32, #tpu.memory_space<vmem>>, vector<16x128xf32>
      %26 = arith.fptosi %25 : vector<16x128xf32> to vector<16x128xi32>
      %cst = arith.constant 5.000000e-01 : f32
      %27 = vector.broadcast %cst : f32 to vector<16x128xf32>
      %28 = arith.cmpf oge, %23, %27 : vector<16x128xf32>
      %29 = arith.extui %28 : vector<16x128xi1> to vector<16x128xi32>
      %30 = arith.cmpi eq, %29, %26 : vector<16x128xi32>
      %c2048_i32_10 = arith.constant 2048 : i32
      %31 = arith.muli %c0_i32_7, %c2048_i32_10 : i32
      %32 = arith.addi %5, %31 : i32
      %33 = vector.broadcast %32 : i32 to vector<16x128xi32>
      %34 = arith.addi %33, %17 : vector<16x128xi32>
      %c2048_i32_11 = arith.constant 2048 : i32
      %35 = vector.broadcast %c2048_i32_11 : i32 to vector<16x128xi32>
      %36 = arith.cmpi slt, %34, %35 : vector<16x128xi32>
      %37 = arith.andi %30, %36 : vector<16x128xi1>
      %38 = arith.extui %37 : vector<16x128xi1> to vector<16x128xi32>
      %39 = vector.shape_cast %38 : vector<16x128xi32> to vector<2x8x128xi32>
      %cst_12 = arith.constant dense<0> : vector<8x128xi32>
      %40 = vector.multi_reduction <add>, %39, %cst_12 [0] : vector<2x8x128xi32> to vector<8x128xi32>
      %41 = arith.addi %19, %40 : vector<8x128xi32>
      %c1_i32_13 = arith.constant 1 : i32
      %42 = arith.addi %18, %41 : vector<8x128xi32>
      %c0_14 = arith.constant 0 : index
      %c0_15 = arith.constant 0 : index
      %43 = vector.load %arg4[%c0_14, %c0_15] : memref<8x128xi32, #tpu.memory_space<vmem>>, vector<8x128xi32>
      tpu.vector_store %arg4[%c0_14, %c0_15], %42 {strides = array<i32>} : memref<8x128xi32, #tpu.memory_space<vmem>>, vector<8x128xi32>,
    } else {
    }
    return
  }
  func.func @transform_0(%arg0: i32, %arg1: i32) -> (i32, i32) {
    %c0_i32 = arith.constant 0 : i32
    %c0_i32_0 = arith.constant 0 : i32
    return %arg1, %c0_i32 : i32, i32
  }
  func.func @transform_1(%arg0: i32, %arg1: i32) -> (i32, i32) {
    %c0_i32 = arith.constant 0 : i32
    %c0_i32_0 = arith.constant 0 : i32
    return %arg1, %c0_i32 : i32, i32
  }
  func.func @transform_2(%arg0: i32, %arg1: i32) -> (i32, i32) {
    %c0_i32 = arith.constant 0 : i32
    %c0_i32_0 = arith.constant 0 : i32
    return %arg0, %c0_i32 : i32, i32
  }
}

</mosaic_0001>

<bundles_post_ra>
// kernel: tpu_custom_call.1
= control target key start
LH: loop header
LB: loop body
LE: loop exit
PB: predicated region body
PF: predicated region fallthrough
CT: control target
= control target key end

     0   :  { %7 = vsyncpa [#allocation3], 0  ;;  %s230_s0 = inlined_call_operand.hbm [shape: f32[16,128], index: 0, kind: input, shape index: {}]   ;;  %s231_s1 = inlined_call_operand.hbm [shape: f32[16,128], index: 1, kind: input, shape index: {}]   ;;  %s232_s2 = inlined_call_operand.hbm [shape: s32[8,128], index: 2, kind: output, shape index: {}]  }
   0x1   :  { %8 = vsyncpa [#allocation6], 0 }
   0x2   :  { %9 = vsyncpa [#allocation4], 0  ;;  %s200_s9 = smov [#allocation2]  }
   0x3   :  { %s15_s10 = sshll.u32 %s200_s9, 4  ;;  %s16_s10 = int_to_ptr.vmem [resolvable:$true] %s15_s10 }
   0x4   :  { %s142_s11 = scalar_lea.vmem %s16_s10, 256  ;;  %p147_p1 = scmp.lt.s32.totalorder %s16_s10, %s16_s10 }
   0x5   :  { %p143_p0 = scmp.ne.s32.totalorder %s16_s10, %s142_s11  ;;  %p148_p2 = scmp.lt.s32.totalorder %s142_s11, %s142_s11 }
   0x7   :  { %p149_p3 = por %p148_p2, %p147_p1 }
   0x9   :  { %p150_p4 = pnand %p149_p3, %p143_p0 }
   0xb   :  { %153 = shalt.err (!%p150_p4)
}
   0xc   :  { %s201_s12 = smov 128   ;;  %s202_s13 = smov 8  }
   0xd   :  { %21 = dma.hbm_to_vmem [thread:$0]  %s230_s0, 256, %s16_s10, [#allocation3], %s201_s12, %s201_s12, %s202_s13  }
   0xe   :  { %s203_s16 = smov [#allocation5]  }
   0xf   :  { %s27_s17 = sshll.u32 %s203_s16, 4  ;;  %s28_s17 = int_to_ptr.vmem [resolvable:$true] %s27_s17 }
  0x10   :  { %s162_s18 = scalar_lea.vmem %s28_s17, 256  ;;  %p167_p6 = scmp.lt.s32.totalorder %s28_s17, %s28_s17 }
  0x11   :  { %p163_p5 = scmp.ne.s32.totalorder %s28_s17, %s162_s18  ;;  %p168_p7 = scmp.lt.s32.totalorder %s162_s18, %s162_s18 }
  0x13   :  { %p169_p8 = por %p168_p7, %p167_p6 }
  0x15   :  { %p170_p9 = pnand %p169_p8, %p163_p5 }
  0x17   :  { %173 = shalt.err (!%p170_p9)
}
  0x18   :  { %33 = dma.hbm_to_vmem [thread:$0]  %s231_s1, 256, %s28_s17, [#allocation6], %s201_s12, %s201_s12, %s202_s13  }
  0x19   :  { %194 = dma.done.wait [#allocation3], 256  }
  0x1a   :  { %195 = vsyncadd [#allocation3], 4294967040 }
  0x1b   :  { %196 = dma.done.wait [#allocation6], 256  }
  0x1c   :  { %197 = vsyncadd [#allocation6], 4294967040  ;;  %v53_v0 = vld [vmem:[#allocation2] sm:$0xff]  ;;  %v54_v1 = vld [vmem:[#allocation2 + $0x8] sm:$0xff]  ;;  %v204_v6 = vmov 0   ;;  %s205_s0 = smov [#allocation7]  }
  0x1d   :  { %v55_v2 = vld [vmem:[#allocation5] sm:$0xff]  ;;  %v56_v3 = vld [vmem:[#allocation5 + $0x8] sm:$0xff]  ;;  %vm59_vm0 = vcmp.ge.f32.partialorder %v53_v0, 0.5  ;;  %vm60_vm1 = vcmp.ge.f32.partialorder %v54_v1, 0.5  ;;  %s114_s1 = sshll.u32 %s205_s0, 4  ;;  %s115_s1 = int_to_ptr.vmem [resolvable:$true] %s114_s1 }
  0x1e   :  { %v124_v4 = vtrunc.f32 %v55_v2  ;;  %v126_v5 = vtrunc.f32 %v56_v3  ;;  %v61_v7 = vsel %vm59_vm0, 1, %v204_v6  ;;  %v62_v9 = vsel %vm60_vm1, 1, %v204_v6  ;;  %s174_s21 = scalar_lea.vmem %s115_s1, 128  ;;  %p179_p11 = scmp.lt.s32.totalorder %s115_s1, %s115_s1 }
  0x1f   :  { %p175_p10 = scmp.ne.s32.totalorder %s115_s1, %s174_s21  ;;  %p180_p12 = scmp.lt.s32.totalorder %s174_s21, %s174_s21 }
  0x20   :  { %v125_v8 = vcvt.f32.s32 %v124_v4  ;;  %v127_v10 = vcvt.f32.s32 %v126_v5 }
  0x21   :  { %p181_p13 = por %p180_p12, %p179_p11 }
  0x22   :  { %vm63_vm2 = vcmp.eq.s32.totalorder %v61_v7, %v125_v8  ;;  %vm64_vm3 = vcmp.eq.s32.totalorder %v62_v9, %v127_v10 }
  0x23   :  { %v65_v11 = vsel %vm63_vm2, 1, %v204_v6  ;;  %v66_v12 = vsel %vm64_vm3, 1, %v204_v6  ;;  %p182_p0 = pnand %p181_p13, %p175_p10 }
  0x24   :  { %v67_v13 = vadd.s32 %v66_v12, %v65_v11 }
  0x26   :  { %69 = vst [vmem:[#allocation7] sm:$0xff] %v67_v13 }
  0x27   :  { %185 = shalt.err (!%p182_p0)
}
  0x28   :  { %117 = dma.vmem_to_hbm [thread:$0]  %s115_s1, 128, %s232_s2, [#allocation4]  }
  0x29   :  { %198 = dma.done.wait [#allocation4], 128  }
  0x2a   :  { %199 = vsyncadd [#allocation4], 4294967168 }
  0x2b   :  { %121 = vsyncpa [#allocation3], 1 }
  0x2c   :  { %122 = vsyncpa [#allocation6], 1 }
  0x2d   :  { %123 = vsyncpa [#allocation4], 1 }

</bundles_post_ra>
